<compile_context>
chip_gen: v7x
topology: tpu7x:2x2x1
jax: 0.10.0
libtpu: 0.0.40
codegen_flags: <defaults>
</compile_context>

<pallas_src>
import jax
import jax.numpy as jnp
from jax.experimental import pallas as pl
from jax.experimental.pallas import tpu as pltpu


def _rope_kernel(x_ref, tbl_ref, o_ref):
    """x_ref: (1, TS, D) interleaved pairs.
    tbl_ref: (2, TS, D) packed f32 tables (tbl[0]=cos per pair, tbl[1]=signed sin)."""
    x = x_ref[...].astype(jnp.float32)                    # (1, TS, D), f32 math
    cos = tbl_ref[0]                                      # (TS, D): c0, c0, c1, c1, ...
    sin = tbl_ref[1]                                      # (TS, D): -s0, +s0, -s1, +s1, ...
    D = x.shape[-1]

    # Adjacent-pair swap (lane 2j <- x[2j+1], lane 2j+1 <- x[2j]) via two XLU
    # rolls + a lane-parity select.  The parity mask comes from a (1, 1, D)
    # iota and broadcasts over TS; the wrapped-around roll lanes are never
    # selected by the mask.
    lane = jax.lax.broadcasted_iota(jnp.int32, (1, 1, D), dimension=2)
    is_even = (lane & 1) == 0
    nxt = pltpu.roll(x, D - 1, axis=2)                    # lane i <- x[i+1]
    prv = pltpu.roll(x, 1, axis=2)                        # lane i <- x[i-1]
    swapped = jnp.where(is_even, nxt, prv)

    #   out[2j]   = x[2j]   * c_j + x[2j+1] * (-s_j)
    #   out[2j+1] = x[2j+1] * c_j + x[2j]   * (+s_j)
    o_ref[...] = (x * cos + swapped * sin).astype(o_ref.dtype)


def make_rope_tables(d_model: int, seq_len: int, theta: float = 10000.0) -> jax.Array:
    """Packed (2, seq_len, d_model) f32 tables, lane-dense for the interleaved layout."""
    assert d_model % 2 == 0, "d_model must be div by 2"
    theta_numerator = jnp.arange(0, d_model, 2, dtype=jnp.float32)          # (D/2,)
    theta_j = 1.0 / (theta ** (theta_numerator / d_model))                  # (D/2,)
    m_i = jnp.arange(seq_len, dtype=jnp.float32)                            # (S,)
    angles = jnp.outer(m_i, theta_j).astype(jnp.float32)                    # (S, D/2)
    cos = jnp.cos(angles)
    sin = jnp.sin(angles)
    cos_full = jnp.repeat(cos, 2, axis=-1)                                  # c0,c0,c1,c1,...
    sin_signed = jnp.stack([-sin, sin], axis=-1).reshape(seq_len, d_model)  # -s0,+s0,-s1,+s1,...
    return jnp.stack([cos_full, sin_signed], axis=0)                        # (2, S, D)


def _vmem_capacity_bytes() -> int:
    try:
        return int(pltpu.get_tpu_info().vmem_capacity_bytes)
    except Exception:
        return 64 * 1024 * 1024  # conservative fallback: v7x per-TensorCore VMEM


_MIN_GRID_STEPS = 8  # >= 2x TensorCores (v7x) and enough steps to hide DMA latency


def _choose_seq_tile(S: int, B: int, D: int, itemsize: int, vmem_budget: int) -> int:
    """Sequence-tile rows (multiple of 8 or the full S), VMEM- and grid-aware."""
    # Double-buffered VMEM per sequence row at width D:
    #   x-in block + out block (itemsize each) + packed (2, TS, D) f32 table block.
    bytes_per_row = D * (4 * itemsize + 16)
    rows_cap = max(8, (vmem_budget // bytes_per_row) // 8 * 8)

    # Keep num_s_tiles * B >= _MIN_GRID_STEPS so BlockSpec double-buffering can
    # overlap DMA with compute and both v7x TensorCores get work (best effort).
    want_tiles = max(1, -(-_MIN_GRID_STEPS // B))               # ceil
    rows_for_tiles = max(8, ((-(-S // want_tiles)) + 7) // 8 * 8)

    rows = min(rows_cap, rows_for_tiles)
    if S <= rows:
        return S  # single full-extent sequence block (always a legal block shape)

    # Prefer a tile that divides S exactly (no ragged / masked final s-tile),
    # without shrinking below half of the budgeted tile size.
    for ts in range(rows, max(rows // 2, 8) - 1, -8):
        if S % ts == 0:
            return ts
    return rows


def rotary_positional_encoding(x: jax.Array, rope_table: jax.Array, *,
                               inplace: bool = False) -> jax.Array:
    """x: (B, S, D) interleaved pairs; rope_table: (2, S, D) from make_rope_tables."""
    B, S, D = x.shape
    assert rope_table.shape == (2, S, D) and rope_table.dtype == jnp.float32

    itemsize = jnp.dtype(x.dtype).itemsize
    vmem_cap = _vmem_capacity_bytes()
    # ~72% of VMEM for the pipelined working set: ~46 MiB on v7x (64 MiB VMEM),
    # ~92 MiB on v5e/v6e (128 MiB) -> 4-16 MiB x tiles, <10% per-step overhead.
    budget = int(vmem_cap * 0.72)

    TS = _choose_seq_tile(S, B, D, itemsize, budget)
    num_s_tiles = pl.cdiv(S, TS)

    block_bytes = TS * D * (4 * itemsize + 16)
    vmem_limit = int(min(max(block_bytes + block_bytes // 4, 16 * 1024 * 1024),
                         int(vmem_cap * 0.9)))

    cost = pl.CostEstimate(
        flops=4 * B * S * D,
        transcendentals=0,
        bytes_accessed=2 * B * S * D * itemsize + 2 * S * D * 4,
    )

    # Grid (S_tiles, B): batch innermost, so the packed table's block index
    # (0, si, 0) is unchanged across consecutive steps and is not re-DMA'd per
    # batch element.  Both axes are independent -> "parallel" for megacore.
    out = pl.pallas_call(
        _rope_kernel,
        out_shape=jax.ShapeDtypeStruct((B, S, D), x.dtype),
        grid=(num_s_tiles, B),
        in_specs=[
            pl.BlockSpec((1, TS, D), lambda si, b: (b, si, 0)),
            pl.BlockSpec((2, TS, D), lambda si, b: (0, si, 0)),
        ],
        out_specs=pl.BlockSpec((1, TS, D), lambda si, b: (b, si, 0)),
        compiler_params=pltpu.CompilerParams(
            dimension_semantics=("parallel", "parallel"),
            vmem_limit_bytes=vmem_limit,
        ),
        cost_estimate=cost,
        input_output_aliases=({0: 0} if inplace else {}),
    )(x, rope_table)
    return out


def _reference(x: jax.Array, theta: float = 10000.0) -> jax.Array:
    """Plain-JAX reference matching the PyTorch complex-multiply semantics."""
    B, S, D = x.shape
    Dh = D // 2
    theta_numerator = jnp.arange(0, D, 2, dtype=jnp.float32)
    theta_j = 1.0 / (theta ** (theta_numerator / D))
    m_i = jnp.arange(S, dtype=jnp.float32)
    angles = jnp.outer(m_i, theta_j)
    cos, sin = jnp.cos(angles), jnp.sin(angles)
    xp = x.astype(jnp.float32).reshape(B, S, Dh, 2)
    xe, xo = xp[..., 0], xp[..., 1]
    oe = xe * cos[None] - xo * sin[None]
    oo = xe * sin[None] + xo * cos[None]
    return jnp.stack([oe, oo], axis=-1).reshape(B, S, D).astype(x.dtype)


if __name__ == "__main__":
    B, S, D = 2, 8, 32  # batch=2, seq_len=8, d_model=32
    theta = 10000.0

    key = jax.random.PRNGKey(0)
    x = jax.random.normal(key, (B, S, D), dtype=jnp.float32)

    rope_table = make_rope_tables(D, S, theta)

    out = rotary_positional_encoding(x, rope_table)
    out = jax.block_until_ready(out)

    ref = _reference(x, theta)
    assert out.shape == x.shape and out.dtype == x.dtype
    assert jnp.allclose(out, ref, atol=1e-5, rtol=1e-5), "mismatch vs reference"

    print("KERNEL_OK")
</pallas_src>

<mosaic_0001>
module attributes {stable_mosaic.version = 11 : i64} {
  func.func @_rope_kernel(%arg0: i32, %arg1: i32, %arg2: memref<1x8x32xf32, #tpu.memory_space<vmem>>, %arg3: memref<2x8x32xf32, #tpu.memory_space<vmem>>, %arg4: memref<1x8x32xf32, #tpu.memory_space<vmem>>) attributes {dimension_semantics = [#tpu.dimension_semantics<parallel>, #tpu.dimension_semantics<parallel>], iteration_bounds = array<i64: 1, 2>, scalar_prefetch = 0 : i64, scratch_operands = 0 : i64, tpu.core_type = #tpu.core_type<tc>, window_params = [{transform_indices = @transform_0, window_bounds = array<i64: 1, 8, 32>}, {transform_indices = @transform_1, window_bounds = array<i64: 2, 8, 32>}, {transform_indices = @transform_2, window_bounds = array<i64: 1, 8, 32>}]} {
    %c0 = arith.constant 0 : index
    %c0_0 = arith.constant 0 : index
    %c0_1 = arith.constant 0 : index
    %0 = vector.load %arg2[%c0, %c0_0, %c0_1] : memref<1x8x32xf32, #tpu.memory_space<vmem>>, vector<1x8x32xf32>
    %c0_2 = arith.constant 0 : index
    %c0_3 = arith.constant 0 : index
    %c0_4 = arith.constant 0 : index
    %1 = vector.load %arg3[%c0_2, %c0_3, %c0_4] : memref<2x8x32xf32, #tpu.memory_space<vmem>>, vector<1x8x32xf32>
    %2 = vector.shape_cast %1 : vector<1x8x32xf32> to vector<8x32xf32>
    %c1 = arith.constant 1 : index
    %c0_5 = arith.constant 0 : index
    %c0_6 = arith.constant 0 : index
    %3 = vector.load %arg3[%c1, %c0_5, %c0_6] : memref<2x8x32xf32, #tpu.memory_space<vmem>>, vector<1x8x32xf32>
    %4 = vector.shape_cast %3 : vector<1x8x32xf32> to vector<8x32xf32>
    %5 = tpu.iota {dimensions = array<i32: 2>} : vector<1x1x32xi32>
    %c1_i32 = arith.constant 1 : i32
    %6 = vector.broadcast %c1_i32 : i32 to vector<1x1x32xi32>
    %7 = arith.andi %5, %6 : vector<1x1x32xi32>
    %c0_i32 = arith.constant 0 : i32
    %8 = vector.broadcast %c0_i32 : i32 to vector<1x1x32xi32>
    %9 = arith.cmpi eq, %7, %8 : vector<1x1x32xi32>
    %c31_i32 = arith.constant 31 : i32
    %10 = tpu.dynamic_rotate %0 by %c31_i32 dim 2 : vector<1x8x32xf32>, i32 -> vector<1x8x32xf32>
    %c1_i32_7 = arith.constant 1 : i32
    %11 = tpu.dynamic_rotate %0 by %c1_i32_7 dim 2 : vector<1x8x32xf32>, i32 -> vector<1x8x32xf32>
    %12 = vector.shape_cast %9 : vector<1x1x32xi1> to vector<1x1x32xi1>
    %13 = vector.broadcast %12 : vector<1x1x32xi1> to vector<1x8x32xi1>
    %14 = arith.select %13, %10, %11 : vector<1x8x32xi1>, vector<1x8x32xf32>
    %15 = vector.shape_cast %2 : vector<8x32xf32> to vector<1x8x32xf32>
    %16 = arith.mulf %0, %15 : vector<1x8x32xf32>
    %17 = vector.shape_cast %4 : vector<8x32xf32> to vector<1x8x32xf32>
    %18 = arith.mulf %14, %17 : vector<1x8x32xf32>
    %19 = arith.addf %16, %18 : vector<1x8x32xf32>
    %c0_8 = arith.constant 0 : index
    %c0_9 = arith.constant 0 : index
    %c0_10 = arith.constant 0 : index
    %20 = vector.load %arg4[%c0_8, %c0_9, %c0_10] : memref<1x8x32xf32, #tpu.memory_space<vmem>>, vector<1x8x32xf32>
    tpu.vector_store %arg4[%c0_8, %c0_9, %c0_10], %19 {strides = array<i32>} : memref<1x8x32xf32, #tpu.memory_space<vmem>>, vector<1x8x32xf32>,
    return
  }
  func.func @transform_0(%arg0: i32, %arg1: i32) -> (i32, i32, i32) {
    %c0_i32 = arith.constant 0 : i32
    %c0_i32_0 = arith.constant 0 : i32
    return %arg1, %arg0, %c0_i32 : i32, i32, i32
  }
  func.func @transform_1(%arg0: i32, %arg1: i32) -> (i32, i32, i32) {
    %c0_i32 = arith.constant 0 : i32
    %c0_i32_0 = arith.constant 0 : i32
    %c0_i32_1 = arith.constant 0 : i32
    return %c0_i32, %arg0, %c0_i32_0 : i32, i32, i32
  }
  func.func @transform_2(%arg0: i32, %arg1: i32) -> (i32, i32, i32) {
    %c0_i32 = arith.constant 0 : i32
    %c0_i32_0 = arith.constant 0 : i32
    return %arg1, %arg0, %c0_i32 : i32, i32, i32
  }
}

</mosaic_0001>

<bundles_post_ra>
// kernel: tpu_custom_call.1
= control target key start
LH: loop header
LB: loop body
LE: loop exit
PB: predicated region body
PF: predicated region fallthrough
CT: control target
= control target key end

     0   :  { %7 = vsyncpa [#allocation3], 0  ;;  %s815_s0 = inlined_call_operand.hbm [shape: f32[2,8,32], index: 0, kind: input, shape index: {}]   ;;  %s816_s1 = inlined_call_operand.hbm [shape: f32[2,8,32], index: 1, kind: input, shape index: {}]   ;;  %s817_s2 = inlined_call_operand.hbm [shape: f32[2,8,32], index: 2, kind: output, shape index: {}]  }
   0x1   :  { %9 = vsyncpa [#allocation3 + $0x1], 0 }
   0x2   :  { %10 = vsyncpa [#allocation6], 0 }
   0x3   :  { %11 = vsyncpa [#allocation4], 0 }
   0x4   :  { %13 = vsyncpa [#allocation4 + $0x1], 0  ;;  %s597_s9 = smov 0   ;;  %s599_s10 = smov 0  }
   0x5   :  { %s601_s11 = smov 0   ;;  %s603_s12 = smov 0  }
   0x6   :  { %s605_s13 = smov 0   ;;  %s607_s14 = smov 0  }
   0x7 LB: > { %s335_s15 = sadd.s32 4294967295, %s572_s14   ;;  %s336_s16 = sadd.s32 4294967294, %s572_s14   ;;  %s572_s14 = sphi %s607_s14, %s19_s14   ;;  %s568_s13 = sphi %s605_s13, %s841_s13   ;;  %s564_s12 = sphi %s603_s12, %s840_s12   ;;  %s560_s11 = sphi %s601_s11, %s839_s11   ;;  %s556_s10 = sphi %s599_s10, %s838_s10   ;;  %s552_s9 = sphi %s597_s9, %s837_s9  }
   0x8   : > { %p53_p0 = scmp.ne.s32.totalorder %s556_s10, %s552_s9  ;;  %p631_p1 = scmp.eq.s32.totalorder %s335_s15, 0 }
   0x9   : > { %p635_p2 = scmp.eq.s32.totalorder %s335_s15, 1  ;;  %p111_p3 = scmp.eq.s32.totalorder %s336_s16, 1 }
   0xa   : > { %s822_s17 = scalar_select %p631_p1, 1, 0 }
   0xb   : > { %s823_s18 = scalar_select %p635_p2, 1, 0 }
   0xc   : > { %p641_p4 = por %p631_p1, %p53_p0  ;;  %p337_p5 = scmp.ge.s32.totalorder %s572_s14, 1 }
   0xd   : > { %p646_p6 = por %p111_p3, %p53_p0  ;;  %p118_p7 = scmp.lt.s32.totalorder %s572_s14, 3 }
   0xe   : > { %s824_s19 = scalar_select %p641_p4, 1, 0 }
   0xf   : > { %s825_s20 = scalar_select %p646_p6, 1, 0 }
  0x10   : > { %p651_p8 = pnand %p337_p5, %p118_p7  ;;  %s574_s22 = smov [#allocation5]  }
  0x11   : > { %s132_s23 = sshll.u32 %s574_s22, 4  ;;  %s28_s25 = sadd.s32 1, %s568_s13  ;;  %s133_s23 = int_to_ptr.vmem [resolvable:$true] %s132_s23 }
  0x12   : > { %s826_s21 = scalar_select %p651_p8, 1, 0 }
  0x13   : > { %p358_p9 = pneg %p651_p8  ;;  %s428_s28 = scalar_lea.hbm %s816_s1, 256 }
  0x14   : > { %p429_p12 = scmp.ne.s32.totalorder %s816_s1, %s428_s28  ;;  %p435_p5 = scmp.lt.u32.totalorder %s428_s28, %s816_s1 }
  0x15   : > { %p660_p11 = pnand %p358_p9, %p631_p1 }
  0x17   : > { %p430_p13 = pneg %p660_p11 }
  0x19   : > { %p431_p0 = pnand %p430_p13, %p429_p12 }
  0x1b   : > { %p432_p3 = pneg %p431_p0 }
  0x1d   : > { %p437_p7 = pnand %p435_p5, %p432_p3 }
  0x1f   : > { %440 = shalt.err (!%p437_p7)
}
  0x20   : > { %s441_s5 = scalar_lea.vmem %s133_s23, 256  ;;  %p449_p1 = scmp.lt.s32.totalorder %s133_s23, %s133_s23 }
  0x21   : > { %p442_p9 = scmp.ne.s32.totalorder %s133_s23, %s441_s5  ;;  %p450_p4 = scmp.lt.s32.totalorder %s441_s5, %s441_s5 }
  0x23   : > { %p444_p10 = pnand %p442_p9, %p430_p13  ;;  %p451_p8 = por %p450_p4, %p449_p1 }
  0x25   : > { %p445_p6 = pneg %p444_p10 }
  0x27   : > { %p452_p2 = pnand %p451_p8, %p445_p6 }
  0x29   : > { %455 = shalt.err (!%p452_p2)
}
  0x2a   : > { %s575_s6 = smov 128   ;;  %s576_s7 = smov 8  }
  0x2b   : > { %361 = dma.hbm_to_vmem [thread:$0]  (!%p660_p11), %s816_s1, 256, %s133_s23, [#allocation6], %s575_s6, %s575_s6, %s576_s7  }
  0x2c   : > { %p29_p1 = scmp.ge.s32.totalorder %s28_s25, 2  ;;  %s40_s16 = sadd.s32 1, %s560_s11 }
  0x2d   : > { %p47_p2 = scmp.ne.s32.totalorder %s560_s11, %s556_s10  ;;  %p48_p4 = scmp.eq.s32.totalorder %s572_s14, 0 }
  0x2e   : > { %s843_s25 = smov (%p29_p1, %s28_s25), 0  ;;  %p829_p8 = scmp.ne.s32.totalorder %s823_s18, 0 }
  0x2f   : > { %p687_p6 = por %p48_p4, %p47_p2  ;;  %s35_s24 = ssub.s32 %s568_s13, %s843_s25 }
  0x30   : > { %p693_p10 = por %p829_p8, %p47_p2  ;;  %p371_p12 = scmp.lt.s32.totalorder %s572_s14, 2 }
  0x31   : > { %p38_p11 = scmp.eq.s32.totalorder %s35_s24, 0  ;;  %s146_s23 = sand.u32 1, %s560_s11  }
  0x32   : > { %s340_s27 = sshll.u32 %s146_s23, 3  ;;  %s341_s29 = sshll.u32 %s568_s13, 7 }
  0x33   : > { %s702_s28 = scalar_select %p38_p11, %s560_s11, %s40_s16  }
  0x34   : > { %s708_s4 = scalar_lea.hbm %s815_s0, %s341_s29  ;;  %s150_s18 = scalar_lea.vmem [#allocation2], %s340_s27 }
  0x35   : > { %s158_s5 = sshll.u32 %s150_s18, 4  ;;  %p714_p13 = pnand %p371_p12, %p687_p6  ;;  %s710_s5 = int_to_ptr.vmem [resolvable:$true] %s158_s5 }
  0x36   : > { %s147_s7 = scalar_lea.sflag [#allocation3], %s146_s23  ;;  %s456_s8 = scalar_lea.hbm %s708_s4, 128 }
  0x37   : > { %p457_p0 = scmp.ne.s32.totalorder %s708_s4, %s456_s8  ;;  %p458_p3 = pneg %p714_p13 }
  0x38   : > { %s461_s24 = scalar_lea.hbm %s815_s0, 256  ;;  %p462_p9 = scmp.lt.u32.totalorder %s708_s4, %s815_s0 }
  0x39   : > { %p459_p5 = pnand %p458_p3, %p457_p0  ;;  %p463_p1 = scmp.lt.u32.totalorder %s461_s24, %s456_s8 }
  0x3a   : > { %p465_p4 = scmp.lt.u32.totalorder %s456_s8, %s708_s4 }
  0x3b   : > { %p460_p7 = pneg %p459_p5  ;;  %p464_p2 = por %p463_p1, %p462_p9 }
  0x3d   : > { %p466_p6 = por %p465_p4, %p464_p2 }
  0x3f   : > { %p467_p8 = pnand %p466_p6, %p460_p7 }
  0x41   : > { %470 = shalt.err (!%p467_p8)
}
  0x42   : > { %s471_s23 = scalar_lea.vmem %s710_s5, 128  ;;  %s577_s29 = smov [#allocation2]  }
  0x43   : > { %p472_p12 = scmp.ne.s32.totalorder %s710_s5, %s471_s23  ;;  %s476_s30 = sshll.u32 %s577_s29, 4  ;;  %s477_s30 = int_to_ptr.vmem [resolvable:$false] %s476_s30 }
  0x44   : > { %s478_s3 = scalar_lea.vmem %s477_s30, 256  ;;  %p479_p5 = scmp.lt.s32.totalorder %s710_s5, %s477_s30 }
  0x45   : > { %p474_p11 = pnand %p472_p12, %p458_p3  ;;  %p480_p9 = scmp.lt.s32.totalorder %s478_s3, %s471_s23 }
  0x47   : > { %p475_p0 = pneg %p474_p11  ;;  %p481_p1 = por %p480_p9, %p479_p5 }
  0x49   : > { %p482_p2 = pnand %p481_p1, %p475_p0 }
  0x4b   : > { %485 = shalt.err (!%p482_p2)
}
  0x4c   : > { %365 = dma.hbm_to_vmem [thread:$0]  (!%p714_p13), %s708_s4, 128, %s710_s5, %s147_s7  }
  0x4d   : > { %p832_p7 = scmp.ne.s32.totalorder %s826_s21, 0 }
  0x4e   : > { %s746_s18 = sand.u32 (!%p832_p7), 1, %s556_s10   ;;  %p833_p3 = scmp.ne.s32.totalorder (!%p832_p7), %s824_s19, 0 }
  0x4f   : > { %167 = sbr.rel (%p832_p7) target bundleno = 461 (0x1cd), region = 28  ;;  %s343_s8 = sshll.u32 (!%p832_p7), %s746_s18, 3 }
  0x50   : > { %s170_s15 = scalar_lea.sflag (!%p832_p7), [#allocation3], %s746_s18  ;;  %s173_s16 = scalar_lea.vmem (!%p832_p7), [#allocation2], %s343_s8 }
  0x56   : > { %539 = dma.done.wait (%p833_p3), %s170_s15, 128  }
  0x57   : > { %541 = vsyncadd (%p833_p3), %s170_s15, 4294967168  ;;  %p834_p13 = scmp.ne.s32.totalorder %s822_s17, 0 }
  0x59   : > { %543 = dma.done.wait (%p834_p13), [#allocation6], 256  }
  0x5a   : > { %545 = vsyncadd (%p834_p13), [#allocation6], 4294967040  ;;  %v198_v0 = vld [vmem:[%s173_s16] sm:$0xff]  ;;  %s578_s21 = smov 32   ;;  %vm206_vm0 = vcmask 1047808   ;;  %s579_s4 = smov 127   ;;  %v202_v5 = vlaneseq }
  0x5b   : > { %207 = vrot.lane.b32.xlu0 %v198_v0, %s578_s21  ;;  %s580_s19 = smov 97   ;;  %v199_v9 = vld [vmem:[#allocation5] sm:$0xff]  ;;  %v201_v10 = vld [vmem:[#allocation5 + $0x8] sm:$0xff]  ;;  %s347_s17 = sshll.u32 %s564_s12, 7  ;;  %vm226_vm2 = vcmask 261120  }
  0x5c   : > { %v203_v6 = vand.u32 127, %v202_v5  ;;  %v223_v12 = vmul.f32 %v199_v9, %v198_v0  ;;  %s197_s5 = scalar_lea.vmem [#allocation7], %s343_s8  ;;  %s766_s22 = scalar_lea.hbm %s817_s2, %s347_s17 }
  0x5d   : > { %s243_s6 = sshll.u32 %s197_s5, 4  ;;  %s229_s27 = scalar_lea.sflag [#allocation4], %s746_s18  ;;  %s768_s6 = int_to_ptr.vmem [resolvable:$true] %s243_s6 }
  0x5e   : > { %v204_v7 = vand.u32 1, %v203_v6  ;;  %s486_s23 = scalar_lea.vmem %s768_s6, 128  ;;  %s581_s12 = smov [#allocation7]  }
  0x5f   : > { %p487_p4 = scmp.ne.s32.totalorder %s768_s6, %s486_s23  ;;  %s490_s29 = sshll.u32 %s581_s12, 4  ;;  %s491_s29 = int_to_ptr.vmem [resolvable:$false] %s490_s29 }
  0x60   : > { %vm205_vm1 = vcmp.eq.s32.totalorder %v204_v7, 0  ;;  %s492_s30 = scalar_lea.vmem %s491_s29, 256  ;;  %p493_p12 = scmp.lt.s32.totalorder %s768_s6, %s491_s29 }
  0x61   : > { %p488_p6 = pnand %p487_p4, %p693_p10  ;;  %p494_p11 = scmp.lt.s32.totalorder %s492_s30, %s486_s23 }
  0x63   : > { %p489_p8 = pneg %p488_p6  ;;  %p495_p0 = por %p494_p11, %p493_p12 }
  0x65   : > { %p496_p5 = pnand %p495_p0, %p489_p8 }
  0xcd   : > { %v208_v1 = vpop.permute.xlu0 %207 }
  0xce   : > { %v209_v2 = vsel %vm206_vm0, %v208_v1, %v198_v0 }
  0xcf   : > { %210 = vrot.lane.b32.xlu0 %v209_v2, %s578_s21 }
 0x141   : > { %v211_v3 = vpop.permute.xlu0 %210 }
 0x142   : > { %v212_v4 = vsel %vm206_vm0, %v211_v3, %v198_v0 }
 0x143   : > { %216 = vrot.lane.b32.xlu1 %v212_v4, %s579_s4 }
 0x147   : > { %219 = vrot.lane.b32.xlu1 %v212_v4, %s580_s19 }
 0x1b5   : > { %v217_v8 = vpop.permute.xlu1 %216 }
 0x1b9   : > { %v220_v11 = vpop.permute.xlu1 %219 }
 0x1ba   : > { %v222_v13 = vsel %vm205_vm1, %v217_v8, %v220_v11 }
 0x1bb   : > { %v224_v14 = vmul.f32 %v222_v13, %v201_v10 }
 0x1bd   : > { %v225_v15 = vadd.f32 %v224_v14, %v223_v12 }
 0x1bf   : > { %227 = vst.msk [vmem:[%s197_s5] sm:$0xff] %vm226_vm2, %v225_v15 }
 0x1c0   : > { %499 = shalt.err (!%p496_p5)
}
 0x1c1   : > { %s500_s3 = scalar_lea.hbm %s766_s22, 128  ;;  %s504_s15 = scalar_lea.hbm %s817_s2, 256 }
 0x1c2   : > { %p501_p9 = scmp.ne.s32.totalorder %s766_s22, %s500_s3  ;;  %p505_p7 = scmp.lt.u32.totalorder %s766_s22, %s817_s2 }
 0x1c3   : > { %p506_p3 = scmp.lt.u32.totalorder %s504_s15, %s500_s3  ;;  %p508_p4 = scmp.lt.u32.totalorder %s500_s3, %s766_s22 }
 0x1c4   : > { %p502_p1 = pnand %p501_p9, %p693_p10 }
 0x1c5   : > { %p507_p13 = por %p506_p3, %p505_p7 }
 0x1c6   : > { %p503_p2 = pneg %p502_p1 }
 0x1c7   : > { %p509_p6 = por %p508_p4, %p507_p13 }
 0x1c9   : > { %p510_p8 = pnand %p509_p6, %p503_p2 }
 0x1cb   : > { %513 = shalt.err (!%p510_p8)
}
 0x1cc   : > { %356 = dma.vmem_to_hbm [thread:$0]  (%p693_p10), %s768_s6, 128, %s766_s22, %s229_s27  }
 0x1cd PF: > { %s255_s4 = sand.u32 1, %s552_s9   ;;  %p835_p12 = scmp.ne.s32.totalorder %s825_s20, 0 }
 0x1ce   : > { %p836_p11 = scmp.ge.s32.totalorder %s572_s14, 2  ;;  %s256_s19 = scalar_lea.sflag [#allocation4], %s255_s4 }
 0x1d0   : > { %p367_p0 = pnand %p836_p11, %p835_p12 }
 0x1d2   : > { %547 = dma.done.wait (!%p367_p0), %s256_s19, 128  }
 0x1d3   : > { %549 = vsyncadd (!%p367_p0), %s256_s19, 4294967168  ;;  %s19_s14 = sadd.s32 1, %s572_s14   ;;  %s837_s9 = smov %s556_s10 }
 0x1d4   : > { %p16_p5 = scmp.ge.s32.totalorder %s19_s14, 4   ;;  %s838_s10 = smov %s560_s11 }
 0x1d5   : > { %s839_s11 = smov %s702_s28  ;;  %s840_s12 = smov %s568_s13 }
 0x1d6   : > { %s841_s13 = smov %s843_s25  ;;  %18 = sbr.rel (!%p16_p5) target bundleno = 7 (0x7), region = 79 }
 0x1dd   :  { %261 = vsyncpa [#allocation3], 1 }
 0x1de   :  { %263 = vsyncpa [#allocation3 + $0x1], 1 }
 0x1df   :  { %264 = vsyncpa [#allocation6], 1 }
 0x1e0   :  { %265 = vsyncpa [#allocation4], 1 }
 0x1e1   :  { %267 = vsyncpa [#allocation4 + $0x1], 1 }

</bundles_post_ra>
